<compile_context>
chip_gen: v7x
topology: tpu7x:2x2x1
jax: 0.10.0
libtpu: 0.0.40
codegen_flags: <defaults>
</compile_context>

<pallas_src>
import functools

import jax
import jax.numpy as jnp
from jax import lax
from jax.experimental import pallas as pl
from jax.experimental.pallas import tpu as pltpu
import numpy as np


def _log_sigmoid(x):
    # numerically stable log(sigmoid(x)) = min(x, 0) - log1p(exp(-|x|))
    return jnp.minimum(x, 0.0) - jnp.log1p(jnp.exp(-jnp.abs(x)))


def _round_up(x, m):
    return (x + m - 1) // m * m


def cbow_kernel(u_ctx_ref, w_all_ref,   # pipelined VMEM blocks
                out_ref,                # (1, 1, 128) partial-loss tile
                *, true_b, tb, n_ctx, n_neg, emb):
    """Pure VPU math on one batch block of TB rows (gather done by XLA)."""
    TB, C, K, E = tb, n_ctx, n_neg, emb

    u_ctx = u_ctx_ref[...].astype(jnp.float32)      # (TB, C*E)
    w_all = w_all_ref[...].astype(jnp.float32)      # (TB, (K+1)*E)

    # Context sum: C lane-chunks of width E, summed elementwise.
    u_sum = u_ctx[:, 0:E]
    for c in range(1, C):                           # tiny static unroll
        u_sum = u_sum + u_ctx[:, c * E:(c + 1) * E]  # (TB, E)

    # Scores against the positive word (chunk 0) and K negatives (chunks 1..K).
    # E=32 is far too small for the MXU, so the contraction stays on the VPU.
    per_row = jnp.zeros((TB, 1), jnp.float32)
    for j in range(K + 1):                          # tiny static unroll
        w_j = w_all[:, j * E:(j + 1) * E]           # (TB, E)
        s = jnp.sum(u_sum * w_j, axis=-1, keepdims=True)   # (TB, 1)
        per_row = per_row + _log_sigmoid(s if j == 0 else -s)

    # Mask batch-padding rows (B was rounded up to a multiple of TB).
    rows = pl.program_id(0) * TB + lax.broadcasted_iota(jnp.int32, (TB, 1), 0)
    per_row = jnp.where(rows < true_b, per_row, 0.0)

    partial = jnp.sum(per_row, keepdims=True)       # (1, 1) block partial
    out_ref[...] = jnp.broadcast_to(partial, out_ref.shape).astype(out_ref.dtype)


def cbow_loss(pos_u_idx, pos_w_idx, neg_w_idx, u_table, w_table, *, block_b=256):
    """Pallas-backed equivalent of CBOWModel.forward.  Returns the scalar loss."""
    B, C = pos_u_idx.shape
    B2, K = neg_w_idx.shape
    assert B2 == B and pos_w_idx.shape == (B,)
    V, E = u_table.shape
    assert w_table.shape == (V, E)

    # Batch tiling: multiple of 8 (sublanes); cap at block_b for big batches.
    TB = min(_round_up(block_b, 8), _round_up(B, 8))
    B_pad = _round_up(B, TB)
    num_blocks = B_pad // TB
    pad = B_pad - B

    # ------------------------------------------------------------------
    # Coalesced gather in the wrapper (XLA gather at full HBM bandwidth).
    # Padded rows gather row 0 (always valid) and are masked in-kernel.
    # Combined word indices: column 0 = positive word, columns 1..K = negatives.
    # ------------------------------------------------------------------
    pos_u_pad = jnp.pad(pos_u_idx.astype(jnp.int32), ((0, pad), (0, 0)))
    w_idx = jnp.concatenate(
        [pos_w_idx.astype(jnp.int32)[:, None], neg_w_idx.astype(jnp.int32)], axis=1)
    w_idx_pad = jnp.pad(w_idx, ((0, pad), (0, 0)))

    # Lane-dense 2-D packing of the gathered rows; native table dtype on the
    # wire (bf16 tables stream at half the bytes), upcast to f32 in-kernel.
    u_ctx = u_table[pos_u_pad].reshape(B_pad, C * E)          # (B_pad, C*E)
    w_all = w_table[w_idx_pad].reshape(B_pad, (K + 1) * E)    # (B_pad, (K+1)*E)

    kernel = functools.partial(cbow_kernel, true_b=B, tb=TB,
                               n_ctx=C, n_neg=K, emb=E)

    grid_spec = pltpu.PrefetchScalarGridSpec(
        num_scalar_prefetch=0,
        grid=(num_blocks,),
        in_specs=[
            pl.BlockSpec((TB, C * E), lambda i: (i, 0)),
            pl.BlockSpec((TB, (K + 1) * E), lambda i: (i, 0)),
        ],
        out_specs=pl.BlockSpec((1, 1, 128), lambda i: (i, 0, 0)),
    )

    partials = pl.pallas_call(
        kernel,
        out_shape=jax.ShapeDtypeStruct((num_blocks, 1, 128), jnp.float32),
        grid_spec=grid_spec,
        compiler_params=pltpu.CompilerParams(
            dimension_semantics=("parallel",)),   # v7x: shard blocks over 2 TCs
    )(u_ctx, w_all)

    return -jnp.sum(partials[:, 0, 0])


def cbow_loss_ref(pos_u_idx, pos_w_idx, neg_w_idx, u_table, w_table):
    """Plain-JAX reference matching the PyTorch forward."""
    u_sum = jnp.sum(u_table[pos_u_idx], axis=1)                  # (B, E)
    w_pos = w_table[pos_w_idx]                                   # (B, E)
    w_neg = w_table[neg_w_idx]                                   # (B, K, E)
    pos = jax.nn.log_sigmoid(jnp.sum(u_sum * w_pos, axis=1))     # (B,)
    neg = jax.nn.log_sigmoid(-jnp.einsum('bke,be->bk', w_neg, u_sum))
    return -(jnp.sum(pos) + jnp.sum(neg))


if __name__ == "__main__":
    # Small, module-consistent shapes.  B=10 exercises batch padding/masking
    # (rounded up to a multiple of 8 rows inside one block).
    V, E = 64, 32       # vocab_size, emb_size
    B, C, K = 10, 4, 5  # batch, context window, negative samples

    key = jax.random.PRNGKey(0)
    k_u, k_w, k_pu, k_pw, k_nw = jax.random.split(key, 5)

    int_range = 0.5 / E
    # u_embeddings ~ uniform(-0.5/emb, 0.5/emb), as in CBOWModel._init_embedding.
    u_table = jax.random.uniform(k_u, (V, E), jnp.float32, -int_range, int_range)
    # Module-faithful init: w_embeddings is zeros.  Also test a random table so
    # the gather / scoring math is actually exercised.
    w_table_zero = jnp.zeros((V, E), jnp.float32)
    w_table_rand = jax.random.uniform(k_w, (V, E), jnp.float32, -int_range, int_range)

    pos_u_idx = jax.random.randint(k_pu, (B, C), 0, V, jnp.int32)
    pos_w_idx = jax.random.randint(k_pw, (B,), 0, V, jnp.int32)
    neg_w_idx = jax.random.randint(k_nw, (B, K), 0, V, jnp.int32)

    for w_table in (w_table_zero, w_table_rand):
        loss = jax.block_until_ready(
            cbow_loss(pos_u_idx, pos_w_idx, neg_w_idx, u_table, w_table))
        ref = cbow_loss_ref(pos_u_idx, pos_w_idx, neg_w_idx, u_table, w_table)
        np.testing.assert_allclose(np.asarray(loss), np.asarray(ref),
                                   rtol=1e-5, atol=1e-5)

    # TODO(synk): sparse-gradient embedding updates and save_embedding are
    # training / host-file-IO concerns with no forward-pass Pallas equivalent.
    print("KERNEL_OK")
</pallas_src>

<mosaic_0001>
module attributes {stable_mosaic.version = 11 : i64} {
  func.func @cbow_kernel(%arg0: i32, %arg1: memref<16x128xf32, #tpu.memory_space<vmem>>, %arg2: memref<16x192xf32, #tpu.memory_space<vmem>>, %arg3: memref<1x1x128xf32, #tpu.memory_space<vmem>>) attributes {dimension_semantics = [#tpu.dimension_semantics<parallel>], iteration_bounds = array<i64: 1>, scalar_prefetch = 0 : i64, scratch_operands = 0 : i64, tpu.core_type = #tpu.core_type<tc>, window_params = [{transform_indices = @transform_0, window_bounds = array<i64: 16, 128>}, {transform_indices = @transform_1, window_bounds = array<i64: 16, 192>}, {transform_indices = @transform_2, window_bounds = array<i64: 1, 1, 128>}]} {
    %c0 = arith.constant 0 : index
    %c0_0 = arith.constant 0 : index
    %0 = vector.load %arg1[%c0, %c0_0] : memref<16x128xf32, #tpu.memory_space<vmem>>, vector<16x128xf32>
    %c0_1 = arith.constant 0 : index
    %c0_2 = arith.constant 0 : index
    %1 = vector.load %arg2[%c0_1, %c0_2] : memref<16x192xf32, #tpu.memory_space<vmem>>, vector<16x192xf32>
    %2 = vector.extract_strided_slice %0 {offsets = [0, 0], sizes = [16, 32], strides = [1, 1]} : vector<16x128xf32> to vector<16x32xf32>
    %3 = vector.extract_strided_slice %0 {offsets = [0, 32], sizes = [16, 32], strides = [1, 1]} : vector<16x128xf32> to vector<16x32xf32>
    %4 = arith.addf %2, %3 : vector<16x32xf32>
    %5 = vector.extract_strided_slice %0 {offsets = [0, 64], sizes = [16, 32], strides = [1, 1]} : vector<16x128xf32> to vector<16x32xf32>
    %6 = arith.addf %4, %5 : vector<16x32xf32>
    %7 = vector.extract_strided_slice %0 {offsets = [0, 96], sizes = [16, 32], strides = [1, 1]} : vector<16x128xf32> to vector<16x32xf32>
    %8 = arith.addf %6, %7 : vector<16x32xf32>
    %cst = arith.constant 0.000000e+00 : f32
    %9 = vector.broadcast %cst : f32 to vector<16x1xf32>
    %10 = vector.extract_strided_slice %1 {offsets = [0, 0], sizes = [16, 32], strides = [1, 1]} : vector<16x192xf32> to vector<16x32xf32>
    %11 = arith.mulf %8, %10 : vector<16x32xf32>
    %cst_3 = arith.constant dense<0.000000e+00> : vector<16xf32>
    %12 = vector.multi_reduction <add>, %11, %cst_3 [1] : vector<16x32xf32> to vector<16xf32>
    %13 = vector.shape_cast %12 : vector<16xf32> to vector<16x1xf32>
    %cst_4 = arith.constant 0.000000e+00 : f32
    %14 = vector.broadcast %cst_4 : f32 to vector<16x1xf32>
    %15 = arith.minimumf %13, %14 : vector<16x1xf32>
    %16 = math.absf %13 : vector<16x1xf32>
    %cst_5 = arith.constant 0.000000e+00 : f32
    %17 = vector.broadcast %cst_5 : f32 to vector<16x1xf32>
    %18 = arith.subf %17, %16 : vector<16x1xf32>
    %19 = math.exp %18 : vector<16x1xf32>
    %20 = math.log1p %19 : vector<16x1xf32>
    %21 = arith.subf %15, %20 : vector<16x1xf32>
    %22 = arith.addf %9, %21 : vector<16x1xf32>
    %23 = vector.extract_strided_slice %1 {offsets = [0, 32], sizes = [16, 32], strides = [1, 1]} : vector<16x192xf32> to vector<16x32xf32>
    %24 = arith.mulf %8, %23 : vector<16x32xf32>
    %cst_6 = arith.constant dense<0.000000e+00> : vector<16xf32>
    %25 = vector.multi_reduction <add>, %24, %cst_6 [1] : vector<16x32xf32> to vector<16xf32>
    %26 = vector.shape_cast %25 : vector<16xf32> to vector<16x1xf32>
    %cst_7 = arith.constant 0.000000e+00 : f32
    %27 = vector.broadcast %cst_7 : f32 to vector<16x1xf32>
    %28 = arith.subf %27, %26 : vector<16x1xf32>
    %cst_8 = arith.constant 0.000000e+00 : f32
    %29 = vector.broadcast %cst_8 : f32 to vector<16x1xf32>
    %30 = arith.minimumf %28, %29 : vector<16x1xf32>
    %31 = math.absf %28 : vector<16x1xf32>
    %cst_9 = arith.constant 0.000000e+00 : f32
    %32 = vector.broadcast %cst_9 : f32 to vector<16x1xf32>
    %33 = arith.subf %32, %31 : vector<16x1xf32>
    %34 = math.exp %33 : vector<16x1xf32>
    %35 = math.log1p %34 : vector<16x1xf32>
    %36 = arith.subf %30, %35 : vector<16x1xf32>
    %37 = arith.addf %22, %36 : vector<16x1xf32>
    %38 = vector.extract_strided_slice %1 {offsets = [0, 64], sizes = [16, 32], strides = [1, 1]} : vector<16x192xf32> to vector<16x32xf32>
    %39 = arith.mulf %8, %38 : vector<16x32xf32>
    %cst_10 = arith.constant dense<0.000000e+00> : vector<16xf32>
    %40 = vector.multi_reduction <add>, %39, %cst_10 [1] : vector<16x32xf32> to vector<16xf32>
    %41 = vector.shape_cast %40 : vector<16xf32> to vector<16x1xf32>
    %cst_11 = arith.constant 0.000000e+00 : f32
    %42 = vector.broadcast %cst_11 : f32 to vector<16x1xf32>
    %43 = arith.subf %42, %41 : vector<16x1xf32>
    %cst_12 = arith.constant 0.000000e+00 : f32
    %44 = vector.broadcast %cst_12 : f32 to vector<16x1xf32>
    %45 = arith.minimumf %43, %44 : vector<16x1xf32>
    %46 = math.absf %43 : vector<16x1xf32>
    %cst_13 = arith.constant 0.000000e+00 : f32
    %47 = vector.broadcast %cst_13 : f32 to vector<16x1xf32>
    %48 = arith.subf %47, %46 : vector<16x1xf32>
    %49 = math.exp %48 : vector<16x1xf32>
    %50 = math.log1p %49 : vector<16x1xf32>
    %51 = arith.subf %45, %50 : vector<16x1xf32>
    %52 = arith.addf %37, %51 : vector<16x1xf32>
    %53 = vector.extract_strided_slice %1 {offsets = [0, 96], sizes = [16, 32], strides = [1, 1]} : vector<16x192xf32> to vector<16x32xf32>
    %54 = arith.mulf %8, %53 : vector<16x32xf32>
    %cst_14 = arith.constant dense<0.000000e+00> : vector<16xf32>
    %55 = vector.multi_reduction <add>, %54, %cst_14 [1] : vector<16x32xf32> to vector<16xf32>
    %56 = vector.shape_cast %55 : vector<16xf32> to vector<16x1xf32>
    %cst_15 = arith.constant 0.000000e+00 : f32
    %57 = vector.broadcast %cst_15 : f32 to vector<16x1xf32>
    %58 = arith.subf %57, %56 : vector<16x1xf32>
    %cst_16 = arith.constant 0.000000e+00 : f32
    %59 = vector.broadcast %cst_16 : f32 to vector<16x1xf32>
    %60 = arith.minimumf %58, %59 : vector<16x1xf32>
    %61 = math.absf %58 : vector<16x1xf32>
    %cst_17 = arith.constant 0.000000e+00 : f32
    %62 = vector.broadcast %cst_17 : f32 to vector<16x1xf32>
    %63 = arith.subf %62, %61 : vector<16x1xf32>
    %64 = math.exp %63 : vector<16x1xf32>
    %65 = math.log1p %64 : vector<16x1xf32>
    %66 = arith.subf %60, %65 : vector<16x1xf32>
    %67 = arith.addf %52, %66 : vector<16x1xf32>
    %68 = vector.extract_strided_slice %1 {offsets = [0, 128], sizes = [16, 32], strides = [1, 1]} : vector<16x192xf32> to vector<16x32xf32>
    %69 = arith.mulf %8, %68 : vector<16x32xf32>
    %cst_18 = arith.constant dense<0.000000e+00> : vector<16xf32>
    %70 = vector.multi_reduction <add>, %69, %cst_18 [1] : vector<16x32xf32> to vector<16xf32>
    %71 = vector.shape_cast %70 : vector<16xf32> to vector<16x1xf32>
    %cst_19 = arith.constant 0.000000e+00 : f32
    %72 = vector.broadcast %cst_19 : f32 to vector<16x1xf32>
    %73 = arith.subf %72, %71 : vector<16x1xf32>
    %cst_20 = arith.constant 0.000000e+00 : f32
    %74 = vector.broadcast %cst_20 : f32 to vector<16x1xf32>
    %75 = arith.minimumf %73, %74 : vector<16x1xf32>
    %76 = math.absf %73 : vector<16x1xf32>
    %cst_21 = arith.constant 0.000000e+00 : f32
    %77 = vector.broadcast %cst_21 : f32 to vector<16x1xf32>
    %78 = arith.subf %77, %76 : vector<16x1xf32>
    %79 = math.exp %78 : vector<16x1xf32>
    %80 = math.log1p %79 : vector<16x1xf32>
    %81 = arith.subf %75, %80 : vector<16x1xf32>
    %82 = arith.addf %67, %81 : vector<16x1xf32>
    %83 = vector.extract_strided_slice %1 {offsets = [0, 160], sizes = [16, 32], strides = [1, 1]} : vector<16x192xf32> to vector<16x32xf32>
    %84 = arith.mulf %8, %83 : vector<16x32xf32>
    %cst_22 = arith.constant dense<0.000000e+00> : vector<16xf32>
    %85 = vector.multi_reduction <add>, %84, %cst_22 [1] : vector<16x32xf32> to vector<16xf32>
    %86 = vector.shape_cast %85 : vector<16xf32> to vector<16x1xf32>
    %cst_23 = arith.constant 0.000000e+00 : f32
    %87 = vector.broadcast %cst_23 : f32 to vector<16x1xf32>
    %88 = arith.subf %87, %86 : vector<16x1xf32>
    %cst_24 = arith.constant 0.000000e+00 : f32
    %89 = vector.broadcast %cst_24 : f32 to vector<16x1xf32>
    %90 = arith.minimumf %88, %89 : vector<16x1xf32>
    %91 = math.absf %88 : vector<16x1xf32>
    %cst_25 = arith.constant 0.000000e+00 : f32
    %92 = vector.broadcast %cst_25 : f32 to vector<16x1xf32>
    %93 = arith.subf %92, %91 : vector<16x1xf32>
    %94 = math.exp %93 : vector<16x1xf32>
    %95 = math.log1p %94 : vector<16x1xf32>
    %96 = arith.subf %90, %95 : vector<16x1xf32>
    %97 = arith.addf %82, %96 : vector<16x1xf32>
    %c16_i32 = arith.constant 16 : i32
    %98 = arith.muli %arg0, %c16_i32 : i32
    %99 = tpu.iota {dimensions = array<i32: 0>} : vector<16x1xi32>
    %100 = vector.broadcast %98 : i32 to vector<16x1xi32>
    %101 = arith.addi %100, %99 : vector<16x1xi32>
    %c10_i32 = arith.constant 10 : i32
    %102 = vector.broadcast %c10_i32 : i32 to vector<16x1xi32>
    %103 = arith.cmpi slt, %101, %102 : vector<16x1xi32>
    %cst_26 = arith.constant 0.000000e+00 : f32
    %104 = vector.broadcast %cst_26 : f32 to vector<16x1xf32>
    %105 = arith.select %103, %97, %104 : vector<16x1xi1>, vector<16x1xf32>
    %106 = vector.shape_cast %105 : vector<16x1xf32> to vector<1x16x1xf32>
    %cst_27 = arith.constant dense<0.000000e+00> : vector<1xf32>
    %107 = vector.multi_reduction <add>, %106, %cst_27 [1, 2] : vector<1x16x1xf32> to vector<1xf32>
    %108 = vector.shape_cast %107 : vector<1xf32> to vector<1x1x1xf32>
    %109 = vector.extract %108[0, 0, 0] : f32 from vector<1x1x1xf32>
    %110 = vector.broadcast %109 : f32 to vector<1x1xf32>
    %111 = vector.shape_cast %110 : vector<1x1xf32> to vector<1x1x1xf32>
    %112 = vector.broadcast %111 : vector<1x1x1xf32> to vector<1x1x128xf32>
    %c0_28 = arith.constant 0 : index
    %c0_29 = arith.constant 0 : index
    %c0_30 = arith.constant 0 : index
    %113 = vector.load %arg3[%c0_28, %c0_29, %c0_30] : memref<1x1x128xf32, #tpu.memory_space<vmem>>, vector<1x1x128xf32>
    tpu.vector_store %arg3[%c0_28, %c0_29, %c0_30], %112 {strides = array<i32>} : memref<1x1x128xf32, #tpu.memory_space<vmem>>, vector<1x1x128xf32>,
    return
  }
  func.func @transform_0(%arg0: i32) -> (i32, i32) {
    %c0_i32 = arith.constant 0 : i32
    %c0_i32_0 = arith.constant 0 : i32
    return %arg0, %c0_i32 : i32, i32
  }
  func.func @transform_1(%arg0: i32) -> (i32, i32) {
    %c0_i32 = arith.constant 0 : i32
    %c0_i32_0 = arith.constant 0 : i32
    return %arg0, %c0_i32 : i32, i32
  }
  func.func @transform_2(%arg0: i32) -> (i32, i32, i32) {
    %c0_i32 = arith.constant 0 : i32
    %c0_i32_0 = arith.constant 0 : i32
    %c0_i32_1 = arith.constant 0 : i32
    return %arg0, %c0_i32, %c0_i32_0 : i32, i32, i32
  }
}

</mosaic_0001>

<bundles_post_ra>
// kernel: tpu_custom_call.1
= control target key start
LH: loop header
LB: loop body
LE: loop exit
PB: predicated region body
PF: predicated region fallthrough
CT: control target
= control target key end

     0   :  { %7 = vsyncpa [#allocation3], 0  ;;  %s833_s0 = inlined_call_operand.hbm [shape: f32[16,128], index: 0, kind: input, shape index: {}]   ;;  %s834_s1 = inlined_call_operand.hbm [shape: f32[16,192], index: 1, kind: input, shape index: {}]   ;;  %s835_s2 = inlined_call_operand.hbm [shape: f32[1,1,128], index: 2, kind: output, shape index: {}]  }
   0x1   :  { %8 = vsyncpa [#allocation6], 0 }
   0x2   :  { %9 = vsyncpa [#allocation4], 0  ;;  %s525_s9 = smov [#allocation2]   ;;  %s453_s13 = scalar_lea.hbm %s833_s0, 256 }
   0x3   :  { %s15_s10 = sshll.u32 %s525_s9, 4  ;;  %p454_p0 = scmp.ne.s32.totalorder %s833_s0, %s453_s13  ;;  %s16_s10 = int_to_ptr.vmem [resolvable:$true] %s15_s10 }
   0x4   :  { %p457_p1 = scmp.lt.u32.totalorder %s453_s13, %s833_s0 }
   0x6   :  { %p459_p2 = pnand %p457_p1, %p454_p0 }
   0x8   :  { %462 = shalt.err (!%p459_p2)
}
   0x9   :  { %s463_s18 = scalar_lea.vmem %s16_s10, 256  ;;  %p468_p4 = scmp.lt.s32.totalorder %s16_s10, %s16_s10 }
   0xa   :  { %p464_p3 = scmp.ne.s32.totalorder %s16_s10, %s463_s18  ;;  %p469_p5 = scmp.lt.s32.totalorder %s463_s18, %s463_s18 }
   0xc   :  { %p470_p6 = por %p469_p5, %p468_p4 }
   0xe   :  { %p471_p7 = pnand %p470_p6, %p464_p3 }
  0x10   :  { %474 = shalt.err (!%p471_p7)
}
  0x11   :  { %s526_s19 = smov 128   ;;  %s527_s20 = smov 8  }
  0x12   :  { %21 = dma.hbm_to_vmem [thread:$0]  %s833_s0, 256, %s16_s10, [#allocation3], %s526_s19, %s526_s19, %s527_s20  }
  0x13   :  { %s528_s23 = smov [#allocation5]   ;;  %s475_s27 = scalar_lea.hbm %s834_s1, 512 }
  0x14   :  { %s27_s24 = sshll.u32 %s528_s23, 4  ;;  %p476_p8 = scmp.ne.s32.totalorder %s834_s1, %s475_s27  ;;  %s28_s24 = int_to_ptr.vmem [resolvable:$true] %s27_s24 }
  0x15   :  { %p479_p9 = scmp.lt.u32.totalorder %s475_s27, %s834_s1 }
  0x17   :  { %p481_p10 = pnand %p479_p9, %p476_p8 }
  0x19   :  { %484 = shalt.err (!%p481_p10)
}
  0x1a   :  { %s485_s4 = scalar_lea.vmem %s28_s24, 512  ;;  %p490_p12 = scmp.lt.s32.totalorder %s28_s24, %s28_s24 }
  0x1b   :  { %p486_p11 = scmp.ne.s32.totalorder %s28_s24, %s485_s4  ;;  %p491_p13 = scmp.lt.s32.totalorder %s485_s4, %s485_s4 }
  0x1d   :  { %p492_p0 = por %p491_p13, %p490_p12 }
  0x1f   :  { %p493_p1 = pnand %p492_p0, %p486_p11 }
  0x21   :  { %496 = shalt.err (!%p493_p1)
}
  0x22   :  { %s529_s0 = smov 256   ;;  %s530_s5 = smov 16  }
  0x23   :  { %33 = dma.hbm_to_vmem [thread:$0]  %s834_s1, 512, %s28_s24, [#allocation6], %s529_s0, %s529_s0, %s530_s5  }
  0x24   :  { %519 = dma.done.wait [#allocation3], 256  }
  0x25   :  { %520 = vsyncadd [#allocation3], 4294967040 }
  0x26   :  { %521 = dma.done.wait [#allocation6], 512  }
  0x27   :  { %522 = vsyncadd [#allocation6], 4294966784  ;;  %v41_v0 = vld [vmem:[#allocation2 + $0x8] sm:$0xff]  ;;  %s531_s8 = smov 64   ;;  %s532_s9 = smov 96   ;;  %v40_v1 = vld [vmem:[#allocation2] sm:$0xff] }
  0x28   :  { %58 = vrot.lane.b32.xlu1 %v41_v0, %s531_s8  ;;  %50 = vrot.lane.b32.xlu0 %v41_v0, %s532_s9  ;;  %s533_s10 = smov 32   ;;  %v42_v2 = vld [vmem:[#allocation5] sm:$0xff]  ;;  %v44_v3 = vld [vmem:[#allocation5 + $0x10] sm:$0xff]  ;;  %v43_v4 = vld [vmem:[#allocation5 + $0x8] sm:$0xff]  ;;  %vm74_vm0 = vcmask 261120   ;;  %vm362_vm14 = vcmask 7168  }
  0x29   :  { %v45_v5 = vld [vmem:[#allocation5 + $0x18] sm:$0xff]  ;;  %s534_s1 = smov [#allocation7]  }
  0x2a   :  { %s383_s11 = sshll.u32 %s534_s1, 4  ;;  %s384_s11 = int_to_ptr.vmem [resolvable:$true] %s383_s11 }
  0x2b   :  { %s497_s13 = scalar_lea.vmem %s384_s11, 16  ;;  %s501_s14 = scalar_lea.vmem %s384_s11, 32 }
  0x2c   :  { %56 = vrot.lane.b32.xlu1 %v40_v1, %s531_s8  ;;  %48 = vrot.lane.b32.xlu0 %v40_v1, %s532_s9  ;;  %p498_p2 = scmp.ne.s32.totalorder %s384_s11, %s497_s13  ;;  %p502_p3 = scmp.lt.s32.totalorder %s384_s11, %s384_s11 }
  0x2d   :  { %p503_p4 = scmp.lt.s32.totalorder %s501_s14, %s497_s13 }
  0x2f   :  { %p504_p5 = por %p503_p4, %p502_p3 }
  0x30   :  { %64 = vrot.lane.b32.xlu1 %v40_v1, %s533_s10  ;;  %66 = vrot.lane.b32.xlu0 %v41_v0, %s533_s10 }
  0x31   :  { %p505_p6 = pnand %p504_p5, %p498_p2 }
  0x34   :  { %115 = vrot.lane.b32.xlu1 %v42_v2, %s532_s9  ;;  %117 = vrot.lane.b32.xlu0 %v44_v3, %s532_s9 }
  0x38   :  { %163 = vrot.lane.b32.xlu1 %v42_v2, %s531_s8  ;;  %165 = vrot.lane.b32.xlu0 %v44_v3, %s531_s8 }
  0x3c   :  { %211 = vrot.lane.b32.xlu1 %v42_v2, %s533_s10  ;;  %213 = vrot.lane.b32.xlu0 %v44_v3, %s533_s10 }
  0x40   :  { %303 = vrot.lane.b32.xlu1 %v43_v4, %s532_s9  ;;  %305 = vrot.lane.b32.xlu0 %v45_v5, %s532_s9 }
  0x9a   :  { %v59_v6 = vpop.permute.xlu1 %58  ;;  %v51_v7 = vpop.permute.xlu0 %50 }
  0x9b   :  { %v55_v10 = vadd.f32 %v51_v7, %v41_v0 }
  0x9d   :  { %v63_v15 = vadd.f32 %v59_v6, %v55_v10 }
  0x9e   :  { %v57_v8 = vpop.permute.xlu1 %56  ;;  %v49_v9 = vpop.permute.xlu0 %48 }
  0x9f   :  { %v54_v11 = vadd.f32 %v49_v9, %v40_v1 }
  0xa1   :  { %v62_v12 = vadd.f32 %v57_v8, %v54_v11 }
  0xa2   :  { %v65_v13 = vpop.permute.xlu1 %64  ;;  %v67_v14 = vpop.permute.xlu0 %66 }
  0xa3   :  { %v70_v16 = vadd.f32 %v65_v13, %v62_v12  ;;  %v71_v17 = vadd.f32 %v67_v14, %v63_v15 }
  0xa5   :  { %v72_v24 = vmul.f32 %v70_v16, %v42_v2  ;;  %v73_v25 = vmul.f32 %v71_v17, %v44_v3  ;;  %v260_v36 = vmul.f32 %v71_v17, %v45_v5  ;;  %v259_v45 = vmul.f32 %v70_v16, %v43_v4 }
  0xa6   :  { %v116_v18 = vpop.permute.xlu1 %115  ;;  %v118_v19 = vpop.permute.xlu0 %117 }
  0xa7   :  { %v121_v20 = vmul.f32 %v116_v18, %v70_v16  ;;  %v122_v21 = vmul.f32 %v118_v19, %v71_v17  ;;  %v75_v29 = vsel %vm74_vm0, %v72_v24, 0.0  ;;  %v78_v30 = vsel %vm74_vm0, %v73_v25, 0.0 }
  0xa8   :  { %v264_v42 = vsel %vm74_vm0, %v260_v36, 0.0  ;;  %v261_v48 = vsel %vm74_vm0, %v259_v45, 0.0 }
  0xa9   :  { %v123_v22 = vsel %vm74_vm0, %v121_v20, 0.0  ;;  %v126_v23 = vsel %vm74_vm0, %v122_v21, 0.0 }
  0xaa   :  { %124 = vadd.xlane.f32.xlu1 %v123_v22  ;;  %127 = vadd.xlane.f32.xlu0 %v126_v23  ;;  %v166_v26 = vpop.permute.xlu0 %165  ;;  %v164_v27 = vpop.permute.xlu1 %163 }
  0xab   :  { %v170_v28 = vmul.f32 %v166_v26, %v71_v17  ;;  %v169_v33 = vmul.f32 %v164_v27, %v70_v16 }
  0xad   :  { %v174_v34 = vsel %vm74_vm0, %v170_v28, 0.0  ;;  %v171_v41 = vsel %vm74_vm0, %v169_v33, 0.0 }
  0xae   :  { %76 = vadd.xlane.f32.xlu1 %v75_v29  ;;  %79 = vadd.xlane.f32.xlu0 %v78_v30  ;;  %v214_v31 = vpop.permute.xlu0 %213  ;;  %v212_v37 = vpop.permute.xlu1 %211 }
  0xaf   :  { %v218_v32 = vmul.f32 %v214_v31, %v71_v17  ;;  %v217_v39 = vmul.f32 %v212_v37, %v70_v16 }
  0xb1   :  { %v222_v35 = vsel %vm74_vm0, %v218_v32, 0.0  ;;  %v219_v43 = vsel %vm74_vm0, %v217_v39, 0.0 }
  0xb2   :  { %175 = vadd.xlane.f32.xlu0 %v174_v34  ;;  %223 = vadd.xlane.f32.xlu1 %v222_v35  ;;  %v306_v38 = vpop.permute.xlu0 %305  ;;  %v304_v46 = vpop.permute.xlu1 %303 }
  0xb3   :  { %v310_v40 = vmul.f32 %v306_v38, %v71_v17  ;;  %v309_v47 = vmul.f32 %v304_v46, %v70_v16 }
  0xb5   :  { %v314_v44 = vsel %vm74_vm0, %v310_v40, 0.0  ;;  %v311_v49 = vsel %vm74_vm0, %v309_v47, 0.0 }
  0xb6   :  { %172 = vadd.xlane.f32.xlu0 %v171_v41  ;;  %265 = vadd.xlane.f32.xlu1 %v264_v42 }
  0xba   :  { %220 = vadd.xlane.f32.xlu0 %v219_v43  ;;  %315 = vadd.xlane.f32.xlu1 %v314_v44  ;;  %v352_v43 = vlaneseq }
  0xbe   :  { %262 = vadd.xlane.f32.xlu0 %v261_v48 }
  0xc2   :  { %312 = vadd.xlane.f32.xlu0 %v311_v49 }
 0x137   :  { %v586_v50 = vpop.xlane.xlu1 %124  ;;  %v588_v51 = vpop.xlane.xlu0 %127 }
 0x138   :  { %v130_v54 = vsub.f32 0.0, %v588_v51  ;;  %v129_v55 = vsub.f32 0.0, %v586_v50 }
 0x13a   :  { %v134_v59 = vand.u32 2147483647, %v130_v54  ;;  %v133_v61 = vand.u32 2147483647, %v129_v55 }
 0x13b   :  { %v590_v52 = vpop.xlane.xlu1 %76  ;;  %v592_v53 = vpop.xlane.xlu0 %79 }
 0x13c   :  { %v84_v56 = vand.u32 2147483647, %v592_v53  ;;  %v136_v3 = vsub.f32 0.0, %v134_v59  ;;  %v83_v4 = vand.u32 2147483647, %v590_v52  ;;  %v135_v8 = vsub.f32 0.0, %v133_v61 }
 0x13d   :  { %v661_v61 = vshrl.u32 %v352_v43, 7  ;;  %v81_v50 = vmin.f32 %v590_v52, 0.0 }
 0x13e   :  { %v86_v62 = vsub.f32 0.0, %v84_v56  ;;  %v139_v12 = vmul.f32 1.442695, %v136_v3  ;;  %v85_v13 = vsub.f32 0.0, %v83_v4  ;;  %v137_v18 = vmul.f32 1.442695, %v135_v8 }
 0x13f   :  { %v597_v57 = vpop.xlane.xlu1 %223  ;;  %v599_v58 = vpop.xlane.xlu0 %175  ;;  %v658_v56 = vmin.f32 %v129_v55, 0.0  ;;  %v82_v55 = vmin.f32 %v592_v53, 0.0 }
 0x140   :  { %v178_v60 = vsub.f32 0.0, %v599_v58  ;;  %v226_v63 = vsub.f32 0.0, %v597_v57  ;;  %v89_v9 = vmul.f32 1.442695, %v86_v62  ;;  %v87_v21 = vmul.f32 1.442695, %v85_v13 }
 0x142   :  { %v182_v0 = vand.u32 2147483647, %v178_v60  ;;  %v230_v10 = vand.u32 2147483647, %v226_v63  ;;  %405 = vpow2.f32 %v89_v9  ;;  %v679_v51 = vmin.f32 %v226_v63, 0.0 }
 0x143   :  { %v609_v1 = vpop.xlane.xlu1 %265  ;;  %v611_v2 = vpop.xlane.xlu0 %172  ;;  %407 = vpow2.f32 %v139_v12 }
 0x144   :  { %v268_v5 = vsub.f32 0.0, %v609_v1  ;;  %v184_v6 = vsub.f32 0.0, %v182_v0  ;;  %v177_v7 = vsub.f32 0.0, %v611_v2  ;;  %v232_v19 = vsub.f32 0.0, %v230_v10 }
 0x145   :  { %v667_v0 = vmin.f32 %v130_v54, 0.0  ;;  %v683_v54 = vmin.f32 %v178_v60, 0.0 }
 0x146   :  { %v272_v14 = vand.u32 2147483647, %v268_v5  ;;  %v187_v15 = vmul.f32 1.442695, %v184_v6  ;;  %v181_v16 = vand.u32 2147483647, %v177_v7 }
 0x147   :  { %v618_v11 = vpop.xlane.xlu1 %315  ;;  %v625_v20 = vpop.xlane.xlu0 %220  ;;  %v235_v26 = vmul.f32 1.442695, %v232_v19  ;;  %v695_v60 = vmin.f32 %v268_v5, 0.0 }
 0x148   :  { %v318_v17 = vsub.f32 0.0, %v618_v11  ;;  %v274_v22 = vsub.f32 0.0, %v272_v14  ;;  %409 = vpow2.f32 %v187_v15  ;;  %v183_v23 = vsub.f32 0.0, %v181_v16 }
 0x149   :  { %v225_v25 = vsub.f32 0.0, %v625_v20  ;;  %411 = vpow2.f32 %v137_v18 }
 0x14a   :  { %v322_v24 = vand.u32 2147483647, %v318_v17  ;;  %413 = vpow2.f32 %v87_v21  ;;  %v277_v27 = vmul.f32 1.442695, %v274_v22  ;;  %v185_v28 = vmul.f32 1.442695, %v183_v23 }
 0x14b   :  { %v229_v30 = vand.u32 2147483647, %v225_v25  ;;  %415 = vpow2.f32 %v235_v26  ;;  %v632_v31 = vpop.xlane.xlu0 %262  ;;  %v703_v23 = vmin.f32 %v177_v7, 0.0 }
 0x14c   :  { %v324_v29 = vsub.f32 0.0, %v322_v24  ;;  %v634_v32 = vpop.eup %405  ;;  %417 = vpow2.f32 %v277_v27  ;;  %v267_v38 = vsub.f32 0.0, %v632_v31 }
 0x14d   :  { %419 = vpow2.f32 %v185_v28  ;;  %v231_v34 = vsub.f32 0.0, %v229_v30  ;;  %v636_v35 = vpop.eup %407  ;;  %v100_v37 = vadd.f32 1.0, %v634_v32  ;;  %v103_v18 = vmul.f32 -0.5, %v634_v32 }
 0x14e   :  { %v327_v33 = vmul.f32 1.442695, %v324_v29  ;;  %v150_v41 = vadd.f32 1.0, %v636_v35  ;;  %v271_v47 = vand.u32 2147483647, %v267_v38  ;;  %v153_v12 = vmul.f32 -0.5, %v636_v35 }
 0x14f   :  { %v233_v40 = vmul.f32 1.442695, %v231_v34  ;;  %v645_v42 = vpop.xlane.xlu0 %312  ;;  %v156_v16 = vand.u32 2147483647, %v636_v35  ;;  %v104_v29 = vadd.f32 1.0, %v103_v18  ;;  %v713_v30 = vmin.f32 %v318_v17, 0.0 }
 0x150   :  { %421 = vpow2.f32 %v327_v33  ;;  %v317_v49 = vsub.f32 0.0, %v645_v42  ;;  %v273_v3 = vsub.f32 0.0, %v271_v47  ;;  %v154_v27 = vadd.f32 1.0, %v153_v12 }
 0x151   :  { %423 = vpow2.f32 %v233_v40  ;;  %vm707_vm1 = vcmp.lt.f32.partialorder %v156_v16, 0.0004427343  ;;  %v106_v34 = vand.u32 2147483647, %v634_v32 }
 0x152   :  { %v638_v36 = vpop.eup %409  ;;  %425 = vlog2.f32 %v100_v37  ;;  %v321_v4 = vand.u32 2147483647, %v317_v49  ;;  %v275_v10 = vmul.f32 1.442695, %v273_v3  ;;  %v105_v3 = vmul.f32 %v634_v32, %v104_v29 }
 0x153   :  { %v642_v39 = vpop.eup %411  ;;  %v198_v45 = vadd.f32 1.0, %v638_v36  ;;  %427 = vlog2.f32 %v150_v41  ;;  %v201_v28 = vmul.f32 -0.5, %v638_v36  ;;  %vm737_vm4 = vcmp.lt.f32.partialorder %v106_v34, 0.0004427343 }
 0x154   :  { %v647_v44 = vpop.eup %413  ;;  %v141_v46 = vadd.f32 1.0, %v642_v39  ;;  %v144_v9 = vmul.f32 -0.5, %v642_v39  ;;  %v323_v14 = vsub.f32 0.0, %v321_v4  ;;  %v147_v22 = vand.u32 2147483647, %v642_v39 }
 0x155   :  { %v653_v48 = vpop.eup %415  ;;  %v91_v59 = vadd.f32 1.0, %v647_v44  ;;  %429 = vlog2.f32 %v198_v45  ;;  %v94_v58 = vmul.f32 -0.5, %v647_v44  ;;  %v97_v33 = vand.u32 2147483647, %v647_v44 }
 0x156   :  { %v663_v62 = vpop.eup %417  ;;  %431 = vlog2.f32 %v141_v46  ;;  %v246_v8 = vadd.f32 1.0, %v653_v48  ;;  %v145_v21 = vadd.f32 1.0, %v144_v9  ;;  %v325_v24 = vmul.f32 1.442695, %v323_v14 }
 0x157   :  { %v671_v6 = vpop.eup %419  ;;  %433 = vlog2.f32 %v91_v59  ;;  %v288_v13 = vadd.f32 1.0, %v663_v62  ;;  %v95_v7 = vadd.f32 1.0, %v94_v58  ;;  %vm720_vm2 = vcmp.lt.f32.partialorder %v147_v22, 0.0004427343 }
 0x158   :  { %v189_v57 = vadd.f32 1.0, %v671_v6  ;;  %435 = vpow2.f32 %v275_v10  ;;  %v718_v40 = vmul.f32 %v642_v39, %v145_v21  ;;  %v249_v11 = vmul.f32 -0.5, %v653_v48 }
 0x159   :  { %437 = vlog2.f32 %v246_v8  ;;  %v155_v45 = vmul.f32 %v636_v35, %v154_v27  ;;  %v202_v46 = vadd.f32 1.0, %v201_v28  ;;  %v291_v47 = vmul.f32 -0.5, %v663_v62 }
 0x15a   :  { %v687_v15 = vpop.eup %421  ;;  %439 = vlog2.f32 %v288_v13  ;;  %v252_v39 = vand.u32 2147483647, %v653_v48  ;;  %v204_v4 = vand.u32 2147483647, %v638_v36  ;;  %v731_v9 = vmul.f32 %v647_v44, %v95_v7 }
 0x15b   :  { %v338_v63 = vadd.f32 1.0, %v687_v15  ;;  %v698_v19 = vpop.eup %423  ;;  %441 = vlog2.f32 %v189_v57  ;;  %vm733_vm3 = vcmp.lt.f32.partialorder %v97_v33, 0.0004427343  ;;  %v250_v16 = vadd.f32 1.0, %v249_v11 }
 0x15c   :  { %v426_v26 = vpop.eup %425  ;;  %v237_v1 = vadd.f32 1.0, %v698_v19  ;;  %v294_v44 = vand.u32 2147483647, %v663_v62  ;;  %v203_v57 = vmul.f32 %v638_v36, %v202_v46  ;;  %v292_v58 = vadd.f32 1.0, %v291_v47 }
 0x15d   :  { %v428_v2 = vpop.eup %427  ;;  %443 = vlog2.f32 %v338_v63  ;;  %v102_v43 = vmul.f32 0.6931472, %v426_v26  ;;  %v192_v63 = vmul.f32 -0.5, %v671_v6  ;;  %vm753_vm5 = vcmp.lt.f32.partialorder %v252_v39, 0.0004427343 }
 0x15e   :  { %445 = vpow2.f32 %v325_v24  ;;  %v152_v59 = vmul.f32 0.6931472, %v428_v2  ;;  %vm757_vm6 = vcmp.lt.f32.partialorder %v204_v4, 0.0004427343  ;;  %v341_v29 = vmul.f32 -0.5, %v687_v15 }
 0x15f   :  { %v430_v37 = vpop.eup %429  ;;  %447 = vlog2.f32 %v237_v1  ;;  %v108_v14 = vsel %vm737_vm4, %v105_v3, %v102_v43  ;;  %v251_v7 = vmul.f32 %v653_v48, %v250_v16  ;;  %vm767_vm7 = vcmp.lt.f32.partialorder %v294_v44, 0.0004427343 }
 0x160   :  { %v432_v17 = vpop.eup %431  ;;  %v200_v12 = vmul.f32 0.6931472, %v430_v37  ;;  %v158_v22 = vsel %vm707_vm1, %v155_v45, %v152_v59  ;;  %v110_v36 = vsub.f32 %v82_v55, %v108_v14  ;;  %v240_v34 = vmul.f32 -0.5, %v698_v19 }
 0x161   :  { %v434_v8 = vpop.eup %433  ;;  %v743_v32 = vmul.f32 0.6931472, %v432_v17  ;;  %v160_v55 = vsub.f32 %v667_v0, %v158_v22  ;;  %v293_v43 = vmul.f32 %v663_v62, %v292_v58  ;;  %v193_v11 = vadd.f32 1.0, %v192_v63 }
 0x162   :  { %v741_v13 = vpop.eup %435  ;;  %v93_v24 = vmul.f32 0.6931472, %v434_v8  ;;  %v206_v1 = vsel %vm757_vm6, %v203_v57, %v200_v12  ;;  %v195_v41 = vand.u32 2147483647, %v671_v6  ;;  %v344_v4 = vand.u32 2147483647, %v687_v15 }
 0x163   :  { %v438_v18 = vpop.eup %437  ;;  %v279_v21 = vadd.f32 1.0, %v741_v13  ;;  %v149_v53 = vsel %vm720_vm2, %v718_v40, %v743_v32  ;;  %v208_v45 = vsub.f32 %v683_v54, %v206_v1  ;;  %v282_v47 = vmul.f32 -0.5, %v741_v13 }
 0x164   :  { %v440_v28 = vpop.eup %439  ;;  %v248_v2 = vmul.f32 0.6931472, %v438_v18  ;;  %v99_v48 = vsel %vm733_vm3, %v731_v9, %v93_v24  ;;  %v162_v3 = vadd.f32 %v160_v55, %v110_v36  ;;  %v342_v40 = vadd.f32 1.0, %v341_v29 }
 0x165   :  { %449 = vlog2.f32 %v279_v21  ;;  %v442_v5 = vpop.eup %441  ;;  %v290_v46 = vmul.f32 0.6931472, %v440_v28  ;;  %v241_v8 = vadd.f32 1.0, %v240_v34  ;;  %v194_v9 = vmul.f32 %v671_v6, %v193_v11 }
 0x166   :  { %v254_v62 = vsel %vm753_vm5, %v251_v7, %v248_v2  ;;  %v191_v0 = vmul.f32 0.6931472, %v442_v5  ;;  %v243_v54 = vand.u32 2147483647, %v698_v19  ;;  %v210_v35 = vadd.f32 %v208_v45, %v162_v3 }
 0x167   :  { %v444_v37 = vpop.eup %443  ;;  %v296_v12 = vsel %vm767_vm7, %v293_v43, %v290_v46  ;;  %v283_v14 = vadd.f32 1.0, %v282_v47  ;;  %v256_v16 = vsub.f32 %v679_v51, %v254_v62  ;;  %vm792_vm8 = vcmp.lt.f32.partialorder %v195_v41, 0.0004427343 }
 0x168   :  { %v446_v17 = vpop.eup %445  ;;  %v340_v10 = vmul.f32 0.6931472, %v444_v37  ;;  %v343_v18 = vmul.f32 %v687_v15, %v342_v40  ;;  %v285_v6 = vand.u32 2147483647, %v741_v13  ;;  %v197_v57 = vsel %vm792_vm8, %v194_v9, %v191_v0 }
 0x169   :  { %v448_v59 = vpop.eup %447  ;;  %v329_v39 = vadd.f32 1.0, %v446_v17  ;;  %vm800_vm9 = vcmp.lt.f32.partialorder %v344_v4, 0.0004427343  ;;  %v242_v63 = vmul.f32 %v698_v19, %v241_v8  ;;  %v332_v21 = vmul.f32 -0.5, %v446_v17 }
 0x16a   :  { %v239_v32 = vmul.f32 0.6931472, %v448_v59  ;;  %v109_v51 = vsub.f32 %v81_v50, %v99_v48  ;;  %v298_v24 = vsub.f32 %v695_v60, %v296_v12  ;;  %v346_v15 = vsel %vm800_vm9, %v343_v18, %v340_v10 }
 0x16b   :  { %451 = vlog2.f32 %v329_v39  ;;  %vm244_vm10 = vcmp.lt.f32.partialorder %v243_v54, 0.0004427343  ;;  %v258_v26 = vadd.f32 %v256_v16, %v210_v35  ;;  %v284_v36 = vmul.f32 %v741_v13, %v283_v14 }
 0x16c   :  { %v245_v27 = vsel %vm244_vm10, %v242_v63, %v239_v32  ;;  %v159_v1 = vsub.f32 %v658_v56, %v149_v53  ;;  %v207_v19 = vsub.f32 %v703_v23, %v197_v57  ;;  %v227_v29 = vmin.f32 %v225_v25, 0.0 }
 0x16d   :  { %vm286_vm11 = vcmp.lt.f32.partialorder %v285_v6, 0.0004427343  ;;  %v348_v52 = vsub.f32 %v713_v30, %v346_v15  ;;  %v333_v60 = vadd.f32 1.0, %v332_v21  ;;  %v354_v5 = vadd.s32 8, %v661_v61 }
 0x16e   :  { %v161_v2 = vadd.f32 %v159_v1, %v109_v51  ;;  %v255_v7 = vsub.f32 %v227_v29, %v245_v27  ;;  %v269_v33 = vmin.f32 %v267_v38, 0.0  ;;  %v335_v13 = vand.u32 2147483647, %v446_v17 }
 0x16f   :  { %v450_v22 = vpop.eup %449  ;;  %v300_v34 = vadd.f32 %v298_v24, %v258_v26  ;;  %v334_v20 = vmul.f32 %v446_v17, %v333_v60  ;;  %v319_v30 = vmin.f32 %v317_v49, 0.0  ;;  %vm359_vm13 = vcmp.lt.s32.totalorder %v354_v5, 10 }
 0x170   :  { %v281_v28 = vmul.f32 0.6931472, %v450_v22  ;;  %v209_v37 = vadd.f32 %v207_v19, %v161_v2  ;;  %vm336_vm12 = vcmp.lt.f32.partialorder %v335_v13, 0.0004427343 }
 0x171   :  { %v350_v25 = vadd.f32 %v348_v52, %v300_v34 }
 0x172   :  { %v287_v50 = vsel %vm286_vm11, %v284_v36, %v281_v28  ;;  %v257_v55 = vadd.f32 %v255_v7, %v209_v37 }
 0x173   :  { %v297_v23 = vsub.f32 %v269_v33, %v287_v50  ;;  %v361_v48 = vsel %vm359_vm13, %v350_v25, 0.0 }
 0x174   :  { %v364_v45 = vsel %vm362_vm14, %v361_v48, 0.0 }
 0x175   :  { %v452_v56 = vpop.eup %451  ;;  %v299_v11 = vadd.f32 %v297_v23, %v257_v55 }
 0x176   :  { %v331_v53 = vmul.f32 0.6931472, %v452_v56 }
 0x178   :  { %v337_v61 = vsel %vm336_vm12, %v334_v20, %v331_v53 }
 0x179   :  { %v347_v43 = vsub.f32 %v319_v30, %v337_v61 }
 0x17b   :  { %v349_v31 = vadd.f32 %v347_v43, %v299_v11 }
 0x17d   :  { %v363_v38 = vsel %vm362_vm14, %v349_v31, 0.0 }
 0x17e   :  { %v365_v46 = vadd.f32 %v364_v45, %v363_v38 }
 0x180   :  { %366 = vadd.xlane.f32.xlu1 %v365_v46 }
 0x20d   :  { %v367_v47 = vpop.xlane.xlu1 %366 }
 0x20e   :  { %v368_v59 = vrot.slane %v367_v47, 4 }
 0x210   :  { %v369_v17 = vadd.f32 %v368_v59, %v367_v47 }
 0x212   :  { %v370_v3 = vrot.slane %v369_v17, 2 }
 0x214   :  { %v371_v41 = vadd.f32 %v370_v3, %v369_v17 }
 0x216   :  { %v372_v40 = vrot.slane %v371_v41, 1 }
 0x218   :  { %v373_v42 = vadd.f32 %v372_v40, %v371_v41 }
 0x21a   :  { %393 = vpush %v373_v42 }
 0x24b   :  { %s394_s12 = spop %393 }
 0x24c   :  { %v375_v49 = vstv %s394_s12 }
 0x24d   :  { %376 = vst [vmem:[#allocation7] sm:$0x1] %v375_v49 }
 0x24e   :  { %508 = shalt.err (!%p505_p6)
}
 0x24f   :  { %s509_s17 = scalar_lea.hbm %s835_s2, 16 }
 0x250   :  { %p510_p7 = scmp.ne.s32.totalorder %s835_s2, %s509_s17  ;;  %p513_p8 = scmp.lt.u32.totalorder %s509_s17, %s835_s2 }
 0x252   :  { %p515_p9 = pnand %p513_p8, %p510_p7 }
 0x254   :  { %518 = shalt.err (!%p515_p9)
}
 0x255   :  { %386 = dma.vmem_to_hbm [thread:$0]  %s384_s11, 16, %s835_s2, [#allocation4]  }
 0x256   :  { %523 = dma.done.wait [#allocation4], 16  }
 0x257   :  { %524 = vsyncadd [#allocation4], 4294967280 }
 0x258   :  { %390 = vsyncpa [#allocation3], 1 }
 0x259   :  { %391 = vsyncpa [#allocation6], 1 }
 0x25a   :  { %392 = vsyncpa [#allocation4], 1 }

</bundles_post_ra>
